<compile_context>
chip_gen: v6e
topology: v6e:2x2x1
jax: 0.10.0
libtpu: 0.0.40
codegen_flags: <defaults>
</compile_context>

<pallas_src>
import jax
import jax.numpy as jnp
from jax.experimental import pallas as pl
from jax.experimental.pallas import tpu as pltpu


def _identity_copy_kernel(x_ref, o_ref):
    o_ref[...] = x_ref[...]


def _pallas_identity(x, *, block_bytes=4 * 1024 * 1024):
    """Identity copy of `x` through a Pallas TPU kernel (large lane-dense tiles)."""
    n = x.size
    itemsize = x.dtype.itemsize

    if n == 0 or (n % 128) != 0:
        # TODO(synk): ragged element counts (not a multiple of 128 lanes) fall
        # back to the zero-cost XLA identity instead of a padded Pallas copy.
        return x

    # ---- choose a lane-dense 2D view: (rows, cols), cols a multiple of 128 ----
    max_cols = max(128, block_bytes // itemsize)
    cols = 128
    while cols * 2 <= max_cols and n % (cols * 2) == 0:
        cols *= 2
    rows = n // cols

    # ---- choose the row block so one buffer is ~block_bytes (VMEM budget) ----
    max_rows = max(1, block_bytes // (cols * itemsize))
    if max_rows >= rows:
        row_block = rows                      # full second-to-last dim: always legal
    else:
        row_block = max(8, (max_rows // 8) * 8)  # keep a multiple of 8 sublanes
        row_block = min(row_block, rows)

    num_blocks = pl.cdiv(rows, row_block)

    y2d = pl.pallas_call(
        _identity_copy_kernel,
        out_shape=jax.ShapeDtypeStruct((rows, cols), x.dtype),
        grid=(num_blocks,),
        in_specs=[pl.BlockSpec((row_block, cols), lambda i: (i, 0))],
        out_specs=pl.BlockSpec((row_block, cols), lambda i: (i, 0)),
        compiler_params=pltpu.CompilerParams(
            dimension_semantics=("parallel",),     # no reduction axis; lets v7x use both TCs
            vmem_limit_bytes=64 * 1024 * 1024,     # 4 double-buffered ~4 MiB tiles fit easily
        ),
        cost_estimate=pl.CostEstimate(
            flops=0,
            transcendentals=0,
            bytes_accessed=2 * n * itemsize,       # pure-bandwidth op
        ),
    )(x.reshape(rows, cols))

    return y2d.reshape(x.shape)


def pallas_print_layer(x):
    """Equivalent of PrintLayer.forward: print(x.shape); return x."""
    print(x.shape)  # host-side side effect, same as the PyTorch module
    return _pallas_identity(x)


if __name__ == "__main__":
    key = jax.random.PRNGKey(0)
    x = jax.random.normal(key, (2, 4, 16, 16), dtype=jnp.float32)

    y = pallas_print_layer(x)
    jax.block_until_ready(y)

    assert y.shape == x.shape and y.dtype == x.dtype
    assert jnp.array_equal(y, x)

    print("KERNEL_OK")
</pallas_src>

<mosaic_0001>
module attributes {stable_mosaic.version = 11 : i64} {
  func.func @_identity_copy_kernel(%arg0: i32, %arg1: memref<1x2048xf32, #tpu.memory_space<vmem>>, %arg2: memref<1x2048xf32, #tpu.memory_space<vmem>>) attributes {dimension_semantics = [#tpu.dimension_semantics<parallel>], iteration_bounds = array<i64: 1>, scalar_prefetch = 0 : i64, scratch_operands = 0 : i64, tpu.core_type = #tpu.core_type<tc>, window_params = [{transform_indices = @transform_0, window_bounds = array<i64: 1, 2048>}, {transform_indices = @transform_1, window_bounds = array<i64: 1, 2048>}]} {
    %c0 = arith.constant 0 : index
    %c0_0 = arith.constant 0 : index
    %0 = vector.load %arg1[%c0, %c0_0] : memref<1x2048xf32, #tpu.memory_space<vmem>>, vector<1x2048xf32>
    %c0_1 = arith.constant 0 : index
    %c0_2 = arith.constant 0 : index
    %1 = vector.load %arg2[%c0_1, %c0_2] : memref<1x2048xf32, #tpu.memory_space<vmem>>, vector<1x2048xf32>
    tpu.vector_store %arg2[%c0_1, %c0_2], %0 {strides = array<i32>} : memref<1x2048xf32, #tpu.memory_space<vmem>>, vector<1x2048xf32>,
    return
  }
  func.func @transform_0(%arg0: i32) -> (i32, i32) {
    %c0_i32 = arith.constant 0 : i32
    %c0_i32_0 = arith.constant 0 : i32
    return %arg0, %c0_i32 : i32, i32
  }
  func.func @transform_1(%arg0: i32) -> (i32, i32) {
    %c0_i32 = arith.constant 0 : i32
    %c0_i32_0 = arith.constant 0 : i32
    return %arg0, %c0_i32 : i32, i32
  }
}

</mosaic_0001>

<bundles_post_ra>
// kernel: tpu_custom_call.1
= control target key start
LH: loop header
LB: loop body
LE: loop exit
PB: predicated region body
PF: predicated region fallthrough
CT: control target
= control target key end

     0   :  { %6 = vsyncpa [#allocation3], 0  ;;  %s104_s0 = inlined_call_operand.hbm [shape: f32[1,2048], index: 0, kind: input, shape index: {}]   ;;  %s105_s1 = inlined_call_operand.hbm [shape: f32[1,2048], index: 1, kind: output, shape index: {}]  }
   0x1   :  { %7 = vsyncpa [#allocation4], 0  ;;  %s86_s6 = smov [#allocation2]  }
   0x2   :  { %s14_s7 = sshll.u32 %s86_s6, 4  ;;  %s15_s7 = int_to_ptr.vmem [resolvable:$true] %s14_s7 }
   0x3   :  { %s50_s8 = scalar_lea.vmem %s15_s7, 256  ;;  %p55_p1 = scmp.lt.s32.totalorder %s15_s7, %s15_s7 }
   0x4   :  { %p51_p0 = scmp.ne.s32.totalorder %s15_s7, %s50_s8  ;;  %p56_p2 = scmp.lt.s32.totalorder %s50_s8, %s50_s8 }
   0x6   :  { %p57_p3 = por %p56_p2, %p55_p1 }
   0x8   :  { %p58_p4 = pnand %p57_p3, %p51_p0 }
   0xa   :  { %61 = shalt.err (!%p58_p4)
}
   0xb   :  { %17 = dma.hbm_to_vmem [thread:$0]  %s104_s0, 256, %s15_s7, [#allocation3]  }
   0xc   :  { %82 = dma.done.wait [#allocation3], 256  }
   0xd   :  { %83 = vsyncadd [#allocation3], 4294967040  ;;  %s87_s11 = smov [#allocation5]   ;;  %v21_v0 = vld [vmem:[#allocation2] sm:$0xff]  ;;  %v22_v1 = vld [vmem:[#allocation2 + $0x8] sm:$0xff] }
   0xe   :  { %s31_s12 = sshll.u32 %s87_s11, 4  ;;  %23 = vst [vmem:[#allocation5] sm:$0xff] %v21_v0  ;;  %24 = vst [vmem:[#allocation5 + $0x8] sm:$0xff] %v22_v1  ;;  %s32_s12 = int_to_ptr.vmem [resolvable:$true] %s31_s12 }
   0xf   :  { %s62_s13 = scalar_lea.vmem %s32_s12, 256  ;;  %p67_p6 = scmp.lt.s32.totalorder %s32_s12, %s32_s12 }
  0x10   :  { %p63_p5 = scmp.ne.s32.totalorder %s32_s12, %s62_s13  ;;  %p68_p7 = scmp.lt.s32.totalorder %s62_s13, %s62_s13 }
  0x12   :  { %p69_p8 = por %p68_p7, %p67_p6 }
  0x14   :  { %p70_p9 = pnand %p69_p8, %p63_p5 }
  0x16   :  { %73 = shalt.err (!%p70_p9)
}
  0x17   :  { %34 = dma.vmem_to_hbm [thread:$0]  %s32_s12, 256, %s105_s1, [#allocation4]  }
  0x18   :  { %84 = dma.done.wait [#allocation4], 256  }
  0x19   :  { %85 = vsyncadd [#allocation4], 4294967040 }
  0x1a   :  { %38 = vsyncpa [#allocation3], 1 }
  0x1b   :  { %39 = vsyncpa [#allocation4], 1 }

</bundles_post_ra>
